<compile_context>
chip_gen: v6e
topology: v6e:2x2x1
jax: 0.10.0
libtpu: 0.0.40
codegen_flags: <defaults>
</compile_context>

<pallas_src>
import jax
import jax.numpy as jnp
from jax.experimental import pallas as pl
from jax.experimental.pallas import tpu as pltpu

# N_PIGMENTS = len(K) in the original script; K is an external pigment table.
# TODO(synk): wire in the real pigment table K; a deterministic synthetic size is used here.
N_PIGMENTS = 8
HIDDEN = 16
IN_FEATURES = 3


def paint_mlp_kernel(x_ref, w1_ref, b1_ref, w2_ref, b2_ref, w3_ref, b3_ref, o_ref):
    # x_ref: [3, BT] bf16 (feature-major batch tile)
    xT = x_ref[...]

    # Layer 1: Linear(3 -> 16) + ReLU   (w1_ref: [16, 3] bf16, b1_ref: [16, 1] f32)
    h1 = jnp.dot(w1_ref[...], xT, preferred_element_type=jnp.float32) + b1_ref[...]
    h1 = jnp.maximum(h1, 0.0)

    # Layer 2: Linear(16 -> 16) + ReLU  (w2_ref: [16, 16] bf16)
    h2 = jnp.dot(w2_ref[...], h1.astype(jnp.bfloat16),
                 preferred_element_type=jnp.float32) + b2_ref[...]
    h2 = jnp.maximum(h2, 0.0)

    # Layer 3: Linear(16 -> N_PIGMENTS) (w3_ref: [8, 16] bf16)
    logits = jnp.dot(w3_ref[...], h2.astype(jnp.bfloat16),
                     preferred_element_type=jnp.float32) + b3_ref[...]   # [8, BT]

    # Softmax over the pigment (sublane) axis, numerically stable.
    m = jnp.max(logits, axis=0, keepdims=True)          # [1, BT]
    e = jnp.exp(logits - m)                              # [8, BT]
    denom = jnp.sum(e, axis=0, keepdims=True)            # [1, BT]
    probs = e * pl.reciprocal(denom, approx=True)        # EUP slot, ~free

    o_ref[...] = probs.astype(o_ref.dtype)               # lane-dense [8, BT] store


def paint_model_forward(x, params, *, block_b=512):
    """x: [B, 3] float32.  params: dict w1,b1,w2,b2,w3,b3 stored (in, out) / (1, out).
    Returns [B, N_PIGMENTS] float32 softmax probabilities."""
    B = x.shape[0]

    # Feature-major, bf16 input for lane-dense loads and bf16-native MXU.
    xT = x.astype(jnp.bfloat16).T                         # [3, B]
    Bp = pl.cdiv(B, block_b) * block_b
    if Bp != B:
        xT = jnp.pad(xT, ((0, 0), (0, Bp - B)))

    # Kernel-ready weights: (out, in) bf16; biases as (out, 1) f32 columns.
    w1T = params["w1"].T.astype(jnp.bfloat16)             # [16, 3]
    w2T = params["w2"].T.astype(jnp.bfloat16)             # [16, 16]
    w3T = params["w3"].T.astype(jnp.bfloat16)             # [8, 16]
    b1 = params["b1"].reshape(-1, 1).astype(jnp.float32)  # [16, 1]
    b2 = params["b2"].reshape(-1, 1).astype(jnp.float32)  # [16, 1]
    b3 = params["b3"].reshape(-1, 1).astype(jnp.float32)  # [8, 1]

    # VMEM-resident full-array blocks for the tiny params (constant index_map).
    def resident(a):
        return pl.BlockSpec(a.shape, lambda i: (0,) * a.ndim,
                            memory_space=pltpu.MemorySpace.VMEM)

    grid = (Bp // block_b,)
    outT = pl.pallas_call(
        paint_mlp_kernel,
        out_shape=jax.ShapeDtypeStruct((N_PIGMENTS, Bp), jnp.float32),
        grid=grid,
        in_specs=[
            pl.BlockSpec((IN_FEATURES, block_b), lambda i: (0, i),
                         memory_space=pltpu.MemorySpace.VMEM),
            resident(w1T), resident(b1),
            resident(w2T), resident(b2),
            resident(w3T), resident(b3),
        ],
        out_specs=pl.BlockSpec((N_PIGMENTS, block_b), lambda i: (0, i),
                               memory_space=pltpu.MemorySpace.VMEM),
        compiler_params=pltpu.CompilerParams(
            dimension_semantics=("parallel",)),
    )(xT, w1T, b1, w2T, b2, w3T, b3)

    return outT[:, :B].T                                  # [B, N_PIGMENTS]


def init_params(key):
    """Deterministic synthetic init mimicking nn.Linear's U(-1/sqrt(fan_in), 1/sqrt(fan_in)).
    Weights stored (in, out), so reference computes y = x @ W + b == x @ W_pt.T + b."""
    k1, k2, k3, k4, k5, k6 = jax.random.split(key, 6)

    def lin(kw, kb, fan_in, fan_out):
        bound = 1.0 / jnp.sqrt(float(fan_in))
        w = jax.random.uniform(kw, (fan_in, fan_out), jnp.float32, -bound, bound)
        b = jax.random.uniform(kb, (1, fan_out), jnp.float32, -bound, bound)
        return w, b

    w1, b1 = lin(k1, k2, IN_FEATURES, HIDDEN)
    w2, b2 = lin(k3, k4, HIDDEN, HIDDEN)
    w3, b3 = lin(k5, k6, HIDDEN, N_PIGMENTS)
    return {"w1": w1, "b1": b1, "w2": w2, "b2": b2, "w3": w3, "b3": b3}


def reference_forward(x, p):
    h1 = jnp.maximum(x @ p["w1"] + p["b1"], 0.0)
    h2 = jnp.maximum(h1 @ p["w2"] + p["b2"], 0.0)
    logits = h2 @ p["w3"] + p["b3"]
    return jax.nn.softmax(logits, axis=-1)


if __name__ == "__main__":
    key = jax.random.PRNGKey(0)
    kx, kp = jax.random.split(key)
    params = init_params(kp)

    # Batch divisible by the tile: exercises a multi-step parallel grid.
    B = 2048
    x = jax.random.uniform(kx, (B, IN_FEATURES), jnp.float32)  # RGB-like triples in [0,1)
    out = jax.block_until_ready(paint_model_forward(x, params))
    ref = reference_forward(x, params)
    assert out.shape == (B, N_PIGMENTS)
    # bf16 matmuls + approx reciprocal -> loosened tolerances vs the f32 reference.
    assert jnp.allclose(jnp.sum(out, axis=-1), 1.0, atol=1e-2)
    assert jnp.allclose(out, ref, atol=2e-2, rtol=0.0)

    # Ragged batch: exercises the padded final tile path.
    B2 = 137
    x2 = jax.random.uniform(jax.random.PRNGKey(1), (B2, IN_FEATURES), jnp.float32)
    out2 = jax.block_until_ready(paint_model_forward(x2, params))
    ref2 = reference_forward(x2, params)
    assert out2.shape == (B2, N_PIGMENTS)
    assert jnp.allclose(jnp.sum(out2, axis=-1), 1.0, atol=1e-2)
    assert jnp.allclose(out2, ref2, atol=2e-2, rtol=0.0)

    print("KERNEL_OK")
</pallas_src>

<mosaic_0001>
module attributes {stable_mosaic.version = 11 : i64} {
  func.func @paint_mlp_kernel(%arg0: i32, %arg1: memref<3x512xbf16, #tpu.memory_space<vmem>>, %arg2: memref<16x3xbf16, #tpu.memory_space<vmem>>, %arg3: memref<16x1xf32, #tpu.memory_space<vmem>>, %arg4: memref<16x16xbf16, #tpu.memory_space<vmem>>, %arg5: memref<16x1xf32, #tpu.memory_space<vmem>>, %arg6: memref<8x16xbf16, #tpu.memory_space<vmem>>, %arg7: memref<8x1xf32, #tpu.memory_space<vmem>>, %arg8: memref<8x512xf32, #tpu.memory_space<vmem>>) attributes {dimension_semantics = [#tpu.dimension_semantics<parallel>], iteration_bounds = array<i64: 4>, scalar_prefetch = 0 : i64, scratch_operands = 0 : i64, tpu.core_type = #tpu.core_type<tc>, window_params = [{transform_indices = @transform_0, window_bounds = array<i64: 3, 512>}, {pipeline_mode = #tpu.pipeline_mode<synchronous>, transform_indices = @transform_1, window_bounds = array<i64: 16, 3>}, {pipeline_mode = #tpu.pipeline_mode<synchronous>, transform_indices = @transform_2, window_bounds = array<i64: 16, 1>}, {pipeline_mode = #tpu.pipeline_mode<synchronous>, transform_indices = @transform_3, window_bounds = array<i64: 16, 16>}, {pipeline_mode = #tpu.pipeline_mode<synchronous>, transform_indices = @transform_4, window_bounds = array<i64: 16, 1>}, {pipeline_mode = #tpu.pipeline_mode<synchronous>, transform_indices = @transform_5, window_bounds = array<i64: 8, 16>}, {pipeline_mode = #tpu.pipeline_mode<synchronous>, transform_indices = @transform_6, window_bounds = array<i64: 8, 1>}, {transform_indices = @transform_7, window_bounds = array<i64: 8, 512>}]} {
    %c0 = arith.constant 0 : index
    %c0_0 = arith.constant 0 : index
    %0 = vector.load %arg1[%c0, %c0_0] : memref<3x512xbf16, #tpu.memory_space<vmem>>, vector<3x512xbf16>
    %c0_1 = arith.constant 0 : index
    %c0_2 = arith.constant 0 : index
    %1 = vector.load %arg2[%c0_1, %c0_2] : memref<16x3xbf16, #tpu.memory_space<vmem>>, vector<16x3xbf16>
    %cst = arith.constant dense<0.000000e+00> : vector<16x512xf32>
    %2 = tpu.matmul %1, %0, %cst {dimension_numbers = #tpu.dot_dimension_numbers<[1], [0], [0], [1], [0, 0, 1, 1], [], []>} : vector<16x3xbf16>, vector<3x512xbf16>, vector<16x512xf32> -> vector<16x512xf32>
    %c0_3 = arith.constant 0 : index
    %c0_4 = arith.constant 0 : index
    %3 = vector.load %arg3[%c0_3, %c0_4] : memref<16x1xf32, #tpu.memory_space<vmem>>, vector<16x1xf32>
    %4 = vector.broadcast %3 : vector<16x1xf32> to vector<16x512xf32>
    %5 = arith.addf %2, %4 : vector<16x512xf32>
    %cst_5 = arith.constant 0.000000e+00 : f32
    %6 = vector.broadcast %cst_5 : f32 to vector<16x512xf32>
    %7 = arith.maximumf %5, %6 : vector<16x512xf32>
    %c0_6 = arith.constant 0 : index
    %c0_7 = arith.constant 0 : index
    %8 = vector.load %arg4[%c0_6, %c0_7] : memref<16x16xbf16, #tpu.memory_space<vmem>>, vector<16x16xbf16>
    %9 = arith.truncf %7 : vector<16x512xf32> to vector<16x512xbf16>
    %cst_8 = arith.constant dense<0.000000e+00> : vector<16x512xf32>
    %10 = tpu.matmul %8, %9, %cst_8 {dimension_numbers = #tpu.dot_dimension_numbers<[1], [0], [0], [1], [0, 0, 1, 1], [], []>} : vector<16x16xbf16>, vector<16x512xbf16>, vector<16x512xf32> -> vector<16x512xf32>
    %c0_9 = arith.constant 0 : index
    %c0_10 = arith.constant 0 : index
    %11 = vector.load %arg5[%c0_9, %c0_10] : memref<16x1xf32, #tpu.memory_space<vmem>>, vector<16x1xf32>
    %12 = vector.broadcast %11 : vector<16x1xf32> to vector<16x512xf32>
    %13 = arith.addf %10, %12 : vector<16x512xf32>
    %cst_11 = arith.constant 0.000000e+00 : f32
    %14 = vector.broadcast %cst_11 : f32 to vector<16x512xf32>
    %15 = arith.maximumf %13, %14 : vector<16x512xf32>
    %c0_12 = arith.constant 0 : index
    %c0_13 = arith.constant 0 : index
    %16 = vector.load %arg6[%c0_12, %c0_13] : memref<8x16xbf16, #tpu.memory_space<vmem>>, vector<8x16xbf16>
    %17 = arith.truncf %15 : vector<16x512xf32> to vector<16x512xbf16>
    %cst_14 = arith.constant dense<0.000000e+00> : vector<8x512xf32>
    %18 = tpu.matmul %16, %17, %cst_14 {dimension_numbers = #tpu.dot_dimension_numbers<[1], [0], [0], [1], [0, 0, 1, 1], [], []>} : vector<8x16xbf16>, vector<16x512xbf16>, vector<8x512xf32> -> vector<8x512xf32>
    %c0_15 = arith.constant 0 : index
    %c0_16 = arith.constant 0 : index
    %19 = vector.load %arg7[%c0_15, %c0_16] : memref<8x1xf32, #tpu.memory_space<vmem>>, vector<8x1xf32>
    %20 = vector.broadcast %19 : vector<8x1xf32> to vector<8x512xf32>
    %21 = arith.addf %18, %20 : vector<8x512xf32>
    %cst_17 = arith.constant dense<0xFF800000> : vector<512xf32>
    %22 = vector.multi_reduction <maximumf>, %21, %cst_17 [0] : vector<8x512xf32> to vector<512xf32>
    %23 = vector.shape_cast %22 : vector<512xf32> to vector<1x512xf32>
    %24 = vector.broadcast %23 : vector<1x512xf32> to vector<8x512xf32>
    %25 = arith.subf %21, %24 : vector<8x512xf32>
    %26 = math.exp %25 : vector<8x512xf32>
    %cst_18 = arith.constant dense<0.000000e+00> : vector<512xf32>
    %27 = vector.multi_reduction <add>, %26, %cst_18 [0] : vector<8x512xf32> to vector<512xf32>
    %28 = vector.shape_cast %27 : vector<512xf32> to vector<1x512xf32>
    %29 = tpu.reciprocal %28 {approx = true} : vector<1x512xf32> -> vector<1x512xf32>
    %30 = vector.broadcast %29 : vector<1x512xf32> to vector<8x512xf32>
    %31 = arith.mulf %26, %30 : vector<8x512xf32>
    %c0_19 = arith.constant 0 : index
    %c0_20 = arith.constant 0 : index
    %32 = vector.load %arg8[%c0_19, %c0_20] : memref<8x512xf32, #tpu.memory_space<vmem>>, vector<8x512xf32>
    tpu.vector_store %arg8[%c0_19, %c0_20], %31 {strides = array<i32>} : memref<8x512xf32, #tpu.memory_space<vmem>>, vector<8x512xf32>,
    return
  }
  func.func @transform_0(%arg0: i32) -> (i32, i32) {
    %c0_i32 = arith.constant 0 : i32
    %c0_i32_0 = arith.constant 0 : i32
    return %c0_i32, %arg0 : i32, i32
  }
  func.func @transform_1(%arg0: i32) -> (i32, i32) {
    %c0_i32 = arith.constant 0 : i32
    %c0_i32_0 = arith.constant 0 : i32
    %c0_i32_1 = arith.constant 0 : i32
    return %c0_i32, %c0_i32_0 : i32, i32
  }
  func.func @transform_2(%arg0: i32) -> (i32, i32) {
    %c0_i32 = arith.constant 0 : i32
    %c0_i32_0 = arith.constant 0 : i32
    %c0_i32_1 = arith.constant 0 : i32
    return %c0_i32, %c0_i32_0 : i32, i32
  }
  func.func @transform_3(%arg0: i32) -> (i32, i32) {
    %c0_i32 = arith.constant 0 : i32
    %c0_i32_0 = arith.constant 0 : i32
    %c0_i32_1 = arith.constant 0 : i32
    return %c0_i32, %c0_i32_0 : i32, i32
  }
  func.func @transform_4(%arg0: i32) -> (i32, i32) {
    %c0_i32 = arith.constant 0 : i32
    %c0_i32_0 = arith.constant 0 : i32
    %c0_i32_1 = arith.constant 0 : i32
    return %c0_i32, %c0_i32_0 : i32, i32
  }
  func.func @transform_5(%arg0: i32) -> (i32, i32) {
    %c0_i32 = arith.constant 0 : i32
    %c0_i32_0 = arith.constant 0 : i32
    %c0_i32_1 = arith.constant 0 : i32
    return %c0_i32, %c0_i32_0 : i32, i32
  }
  func.func @transform_6(%arg0: i32) -> (i32, i32) {
    %c0_i32 = arith.constant 0 : i32
    %c0_i32_0 = arith.constant 0 : i32
    %c0_i32_1 = arith.constant 0 : i32
    return %c0_i32, %c0_i32_0 : i32, i32
  }
  func.func @transform_7(%arg0: i32) -> (i32, i32) {
    %c0_i32 = arith.constant 0 : i32
    %c0_i32_0 = arith.constant 0 : i32
    return %c0_i32, %arg0 : i32, i32
  }
}

</mosaic_0001>

<bundles_post_ra>
// kernel: tpu_custom_call.1
= control target key start
LH: loop header
LB: loop body
LE: loop exit
PB: predicated region body
PF: predicated region fallthrough
CT: control target
= control target key end

     0   :  { %12 = vsyncpa [#allocation3], 0  ;;  %s1114_s0 = inlined_call_operand.vmem [shape: bf16[3,2048], index: 0, kind: input, shape index: {}]   ;;  %s1115_s1 = inlined_call_operand.vmem [shape: bf16[16,3], index: 1, kind: input, shape index: {}]   ;;  %s1116_s2 = inlined_call_operand.vmem [shape: f32[16,1], index: 2, kind: input, shape index: {}]   ;;  %s1117_s3 = inlined_call_operand.vmem [shape: bf16[16,16], index: 3, kind: input, shape index: {}]   ;;  %s1118_s4 = inlined_call_operand.vmem [shape: f32[16,1], index: 4, kind: input, shape index: {}]   ;;  %s1119_s5 = inlined_call_operand.vmem [shape: bf16[8,16], index: 5, kind: input, shape index: {}]   ;;  %s1120_s6 = inlined_call_operand.vmem [shape: f32[8,1], index: 6, kind: input, shape index: {}]   ;;  %s1121_s7 = inlined_call_operand.hbm [shape: f32[8,2048], index: 7, kind: output, shape index: {}]  }
   0x1   :  { %14 = vsyncpa [#allocation3 + $0x1], 0  ;;  %s986_s24 = smov 0   ;;  %s988_s25 = smov 0  }
   0x2   :  { %s990_s26 = smov 0   ;;  %s992_s27 = smov 0  }
   0x3 LB: > { %s1007_s28 = sadd.s32 4294967295, %s940_s27   ;;  %s796_s29 = sadd.s32 4294967294, %s940_s27   ;;  %s940_s27 = sphi %s992_s27, %s1127_s27   ;;  %s936_s26 = sphi %s990_s26, %s1126_s26   ;;  %s932_s25 = sphi %s988_s25, %s1125_s25   ;;  %s928_s24 = sphi %s986_s24, %s1124_s24  }
   0x4   : > { %s1011_s30 = sadd.s32 1, %s940_s27   ;;  %s179_s8 = sadd.s32 1, %s936_s26 }
   0x5   : > { %s176_s9 = ssub.s32 %s940_s27, %s1011_s30  ;;  %p189_p0 = scmp.ne.s32.totalorder %s936_s26, %s932_s25 }
   0x6   : > { %p177_p1 = scmp.eq.s32.totalorder %s176_s9, 0  ;;  %p190_p2 = scmp.eq.s32.totalorder %s1007_s28, 3 }
   0x7   : > { %p195_p3 = scmp.ne.s32.totalorder %s932_s25, %s928_s24  ;;  %p196_p4 = scmp.eq.s32.totalorder %s796_s29, 3 }
   0x8   : > { %s1022_s10 = scalar_select %p177_p1, %s936_s26, %s179_s8  }
   0x9   : > { %p1024_p5 = por %p190_p2, %p189_p0  ;;  %p1028_p6 = por %p196_p4, %p195_p3 }
   0xa   : > { %p799_p7 = scmp.ge.s32.totalorder %s940_s27, 1  ;;  %p241_p8 = scmp.lt.s32.totalorder %s940_s27, 5 }
   0xc   : > { %p242_p9 = pnand %p799_p7, %p241_p8 }
   0xd   : > { %s801_s13 = sshll.u32 (!%p242_p9), %s1007_s28, 2  ;;  %s270_s20 = sand.u32 (!%p242_p9), 1, %s932_s25  }
   0xe   : > { %245 = sbr.rel (%p242_p9) target bundleno = 724 (0x2d4), region = 48  ;;  %p274_p10 = scmp.lt.s32.totalorder (!%p242_p9), %s801_s13, 15 }
   0xf   : > { %s816_s22 = sshll.u32 (!%p242_p9), %s1007_s28, 9  ;;  %s723_s14 = scalar_lea.sflag (!%p242_p9), [#allocation3], %s270_s20 }
  0x10   : > { %s945_s15 = smov (!%p242_p9), [#allocation2]  }
  0x13   : > { %v306_v0 = vlaneseq  ;;  %v942_v1 = vmov 1983009808   ;;  %vm323_vm0 = vcmask 1040384   ;;  %v943_v4 = vmov 0   ;;  %v284_v5 = vld [vmem:[%s1116_s2] sm:$0xff]  ;;  %s1129_s13 = smov (!%p274_p10, %s801_s13), 15 }
  0x14   : > { %v304_v2 = vunpack.c.l.s4 %v942_v1  ;;  %371 = vmatprep.mubr.bf16.mxu0 %v943_v4  ;;  %414 = vmatprep.mubr.bf16.mxu1 %v943_v4  ;;  %s802_s16 = sshll.u32 %s1129_s13, 1  ;;  %vm324_vm1 = vcmask 1041408   ;;  %v944_v8 = vmov 65535   ;;  %v285_v10 = vld [vmem:[%s1116_s2 + $0x8] sm:$0xff]  ;;  %v559_v15 = vld [vmem:[%s1120_s6] sm:$0xff]  ;;  %vm319_vm2 = vcmask 23552   ;;  %s1079_s13 = scalar_lea.hbm %s1121_s7, %s816_s22 }
  0x15   : > { %v307_v3 = vshrl.u32 %v306_v0, 7  ;;  %859 = vset.pattern.permute.xlu0 %v943_v4  ;;  %860 = vset.pattern.permute.xlu1 %v943_v4  ;;  %v325_v9 = vsel %vm323_vm0, 4294967295, %v944_v8  ;;  %s277_s21 = scalar_lea.vmem %s1114_s0, %s802_s16  ;;  %v862_v23 = vld [vmem:[%s1115_s1] sm:$0xff]   ;;  %v440_v25 = vld [vmem:[%s1118_s4 + $0x8] sm:$0xff]  ;;  %vm456_vm3 = vcmask 130048   ;;  %s884_s16 = sshll.u32 %s945_s15, 4  ;;  %s885_s16 = int_to_ptr.vmem [resolvable:$false] %s884_s16 }
  0x16   : > { %v305_v6 = vunpack.c.0.s8 %v304_v2  ;;  %288 = vperm.xlu0 %859, %v284_v5   ;;  %v281_v11 = vld [vmem:[%s277_s21] sm:$0xff]  ;;  %v326_v13 = vsel %vm324_vm1, %v325_v9, 0  ;;  %s800_s21 = sshll.u32 %s270_s20, 5  ;;  %s886_s17 = scalar_lea.vmem %s885_s16, 1024 }
  0x17   : > { %v302_v14 = vcombine.high %v281_v11, %v281_v11  ;;  %v439_v24 = vld [vmem:[%s1118_s4] sm:$0xff]  ;;  %s272_s23 = scalar_lea.vmem [#allocation2], %s800_s21 }
  0x18   : > { %v308_v7 = vsub.s32 %v305_v6, %v307_v3  ;;  %443 = vperm.xlu1 %860, %v439_v24   ;;  %v863_v55 = vld [vmem:[%s1117_s3] sm:$0xff]   ;;  %s737_s29 = sshll.u32 %s272_s23, 4  ;;  %s738_s29 = int_to_ptr.vmem [resolvable:$true] %s737_s29 }
  0x19   : > { %s880_s28 = scalar_lea.vmem %s738_s29, 512  ;;  %p887_p0 = scmp.lt.s32.totalorder %s738_s29, %s885_s16 }
  0x1a   : > { %v309_v12 = vrot.slane %v281_v11, %v308_v7  ;;  %293 = vperm.xlu0 %859, %v285_v10   ;;  %v316_v17 = vrot.slane %v302_v14, %v308_v7  ;;  %p881_p11 = scmp.ne.s32.totalorder %s738_s29, %s880_s28  ;;  %p888_p1 = scmp.lt.s32.totalorder %s886_s17, %s880_s28 }
  0x1c   : > { %v317_v16 = vcombine.high %v309_v12, %v309_v12  ;;  %v328_v18 = vand.u32 %v326_v13, %v309_v12  ;;  %v318_v20 = vcombine.high %v316_v17, %v316_v17  ;;  %v334_v21 = vand.u32 %v326_v13, %v316_v17  ;;  %448 = vperm.xlu1 %860, %v440_v25   ;;  %p882_p12 = pnand %p881_p11, %p1024_p5  ;;  %p889_p2 = por %p888_p1, %p887_p0 }
  0x1e   : > { %v331_v19 = vand.u32 %v326_v13, %v317_v16  ;;  %562 = vperm.xlu0 %859, %v559_v15   ;;  %v337_v22 = vand.u32 %v326_v13, %v318_v20  ;;  %p883_p13 = pneg %p882_p12 }
  0x20   : > { %353 = vmatprep.subr.bf16.mxu0 %v331_v19  ;;  %396 = vmatprep.subr.bf16.mxu1 %v337_v22  ;;  %p890_p3 = pnand %p889_p2, %p883_p13 }
  0x21   : > { %354 = vmatpush1.bf16.msra.mxu0 %v328_v18  ;;  %397 = vmatpush1.bf16.msra.mxu1 %v334_v21 }
  0x24   : > { %804 = vmatmul.mubr.msk.bf16.vlgmr.msra.gmra.mxu0 %vm319_vm2, %v862_v23  ;;  %805 = vmatmul.mubr.msk.bf16.vlgmr.msra.gmra.mxu1 %vm319_vm2, %v862_v23  ;;  %v554_v23 = vld [vmem:[%s1119_s5] sm:$0xf] }
  0x25   : > { %492 = vmatprep.mubr.bf16.mxu0 %v943_v4  ;;  %535 = vmatprep.mubr.bf16.mxu1 %v943_v4 }
  0x91   : > { %v289_v26 = vpop.permute.xlu0 %288 }
  0x93   : > { %v444_v57 = vpop.permute.xlu1 %443 }
  0x95   : > { %v294_v30 = vpop.permute.xlu0 %293 }
  0x97   : > { %v449_v59 = vpop.permute.xlu1 %448 }
  0x99   : > { %v563_v24 = vpop.permute.xlu0 %562 }
  0xe4   : > { %v373_v27 = vpop.f32.mrf.mxu0  ;;  %v416_v29 = vpop.f32.mrf.mxu1 }
  0xe5   : > { %v374_v35 = vadd.f32 %v373_v27, %v289_v26  ;;  %v417_v41 = vadd.f32 %v416_v29, %v289_v26 }
  0xe6   : > { %v375_v28 = vpop.f32.mrf.mxu0  ;;  %v418_v32 = vpop.f32.mrf.mxu1 }
  0xe7   : > { %v376_v33 = vadd.f32 %v375_v28, %v289_v26  ;;  %v419_v38 = vadd.f32 %v418_v32, %v289_v26  ;;  %v425_v47 = vmax.f32 %v374_v35, 0.0  ;;  %v427_v52 = vmax.f32 %v417_v41, 0.0 }
  0xe8   : > { %v377_v31 = vpop.f32.mrf.mxu0  ;;  %v420_v37 = vpop.f32.mrf.mxu1 }
  0xe9   : > { %v378_v34 = vadd.f32 %v377_v31, %v294_v30  ;;  %v421_v40 = vadd.f32 %v420_v37, %v294_v30  ;;  %v426_v44 = vmax.f32 %v376_v33, 0.0  ;;  %v428_v49 = vmax.f32 %v419_v38, 0.0 }
  0xea   : > { %v379_v36 = vpop.f32.mrf.mxu0  ;;  %v422_v43 = vpop.f32.mrf.mxu1 }
  0xeb   : > { %v380_v39 = vadd.f32 %v379_v36, %v294_v30  ;;  %v429_v42 = vmax.f32 %v378_v34, 0.0  ;;  %v423_v46 = vadd.f32 %v422_v43, %v294_v30  ;;  %v431_v48 = vmax.f32 %v421_v40, 0.0 }
  0xed   : > { %v430_v45 = vmax.f32 %v380_v39, 0.0  ;;  %v432_v51 = vmax.f32 %v423_v46, 0.0  ;;  %v435_v53 = vpack.c.bf16 %v429_v42, %v425_v47  ;;  %v437_v56 = vpack.c.bf16 %v431_v48, %v427_v52 }
  0xef   : > { %v436_v50 = vpack.c.bf16 %v430_v45, %v426_v44  ;;  %v438_v54 = vpack.c.bf16 %v432_v51, %v428_v49 }
  0xf1   : > { %474 = vmatprep.subr.bf16.mxu0 %v436_v50  ;;  %517 = vmatprep.subr.bf16.mxu1 %v438_v54 }
  0xf2   : > { %475 = vmatpush1.bf16.msra.mxu0 %v435_v53  ;;  %518 = vmatpush1.bf16.msra.mxu1 %v437_v56 }
  0xf5   : > { %807 = vmatmul.mubr.msk.bf16.vlgmr.msra.gmra.mxu0 %vm456_vm3, %v863_v55  ;;  %808 = vmatmul.mubr.msk.bf16.vlgmr.msra.gmra.mxu1 %vm456_vm3, %v863_v55 }
  0xf6   : > { %600 = vmatprep.mubr.bf16.mxu0 %v943_v4  ;;  %641 = vmatprep.mubr.bf16.mxu1 %v943_v4 }
 0x1b5   : > { %v494_v58 = vpop.f32.mrf.mxu0  ;;  %v537_v61 = vpop.f32.mrf.mxu1 }
 0x1b6   : > { %v495_v2 = vadd.f32 %v494_v58, %v444_v57  ;;  %v538_v9 = vadd.f32 %v537_v61, %v444_v57 }
 0x1b7   : > { %v496_v60 = vpop.f32.mrf.mxu0  ;;  %v539_v63 = vpop.f32.mrf.mxu1 }
 0x1b8   : > { %v497_v0 = vadd.f32 %v496_v60, %v444_v57  ;;  %v540_v6 = vadd.f32 %v539_v63, %v444_v57  ;;  %v546_v14 = vmax.f32 %v495_v2, 0.0  ;;  %v548_v19 = vmax.f32 %v538_v9, 0.0 }
 0x1b9   : > { %v498_v62 = vpop.f32.mrf.mxu0  ;;  %v541_v5 = vpop.f32.mrf.mxu1 }
 0x1ba   : > { %v499_v1 = vadd.f32 %v498_v62, %v449_v59  ;;  %v542_v8 = vadd.f32 %v541_v5, %v449_v59  ;;  %v547_v12 = vmax.f32 %v497_v0, 0.0  ;;  %v549_v16 = vmax.f32 %v540_v6, 0.0 }
 0x1bb   : > { %v500_v3 = vpop.f32.mrf.mxu0  ;;  %v543_v11 = vpop.f32.mrf.mxu1 }
 0x1bc   : > { %v501_v7 = vadd.f32 %v500_v3, %v449_v59  ;;  %v550_v10 = vmax.f32 %v499_v1, 0.0  ;;  %v544_v13 = vadd.f32 %v543_v11, %v449_v59  ;;  %v552_v15 = vmax.f32 %v542_v8, 0.0 }
 0x1be   : > { %v551_v4 = vmax.f32 %v501_v7, 0.0  ;;  %v553_v18 = vmax.f32 %v544_v13, 0.0  ;;  %v555_v20 = vpack.c.bf16 %v550_v10, %v546_v14  ;;  %v557_v22 = vpack.c.bf16 %v552_v15, %v548_v19 }
 0x1c0   : > { %v556_v17 = vpack.c.bf16 %v551_v4, %v547_v12  ;;  %v558_v21 = vpack.c.bf16 %v553_v18, %v549_v16 }
 0x1c2   : > { %582 = vmatprep.subr.bf16.mxu0 %v556_v17  ;;  %623 = vmatprep.subr.bf16.mxu1 %v558_v21 }
 0x1c3   : > { %583 = vmatpush1.bf16.msra.mxu0 %v555_v20  ;;  %624 = vmatpush1.bf16.msra.mxu1 %v557_v22 }
 0x1c6   : > { %809 = vmatmul.mubr.msk.bf16.vlgmr.msra.gmra.mxu0 %vm456_vm3, %v554_v23  ;;  %810 = vmatmul.mubr.msk.bf16.vlgmr.msra.gmra.mxu1 %vm456_vm3, %v554_v23 }
 0x286   : > { %v602_v25 = vpop.f32.mrf.mxu0  ;;  %v643_v28 = vpop.f32.mrf.mxu1 }
 0x287   : > { %v603_v26 = vadd.f32 %v602_v25, %v563_v24  ;;  %v644_v31 = vadd.f32 %v643_v28, %v563_v24 }
 0x288   : > { %v604_v27 = vpop.f32.mrf.mxu0  ;;  %v645_v32 = vpop.f32.mrf.mxu1 }
 0x289   : > { %v650_v29 = vrot.slane %v603_v26, 4  ;;  %v605_v30 = vadd.f32 %v604_v27, %v563_v24  ;;  %v662_v36 = vrot.slane %v644_v31, 4  ;;  %v646_v37 = vadd.f32 %v645_v32, %v563_v24 }
 0x28a   : > { %v606_v33 = vpop.f32.mrf.mxu0  ;;  %v647_v38 = vpop.f32.mrf.mxu1 }
 0x28b   : > { %v651_v34 = vmax.f32 %v603_v26, %v650_v29  ;;  %v656_v35 = vrot.slane %v605_v30, 4  ;;  %v663_v42 = vmax.f32 %v644_v31, %v662_v36  ;;  %v668_v43 = vrot.slane %v646_v37, 4 }
 0x28c   : > { %v607_v39 = vpop.f32.mrf.mxu0  ;;  %v648_v44 = vpop.f32.mrf.mxu1 }
 0x28d   : > { %v652_v40 = vrot.slane %v651_v34, 2  ;;  %v657_v41 = vmax.f32 %v605_v30, %v656_v35  ;;  %v664_v47 = vrot.slane %v663_v42, 2  ;;  %v669_v48 = vmax.f32 %v646_v37, %v668_v43 }
 0x28f   : > { %v653_v45 = vmax.f32 %v651_v34, %v652_v40  ;;  %v658_v46 = vrot.slane %v657_v41, 2  ;;  %v665_v51 = vmax.f32 %v663_v42, %v664_v47  ;;  %v670_v52 = vrot.slane %v669_v48, 2 }
 0x291   : > { %v654_v49 = vrot.slane %v653_v45, 1  ;;  %v659_v50 = vmax.f32 %v657_v41, %v658_v46  ;;  %v666_v55 = vrot.slane %v665_v51, 1  ;;  %v671_v56 = vmax.f32 %v669_v48, %v670_v52 }
 0x293   : > { %v655_v53 = vmax.f32 %v653_v45, %v654_v49  ;;  %v660_v54 = vrot.slane %v659_v50, 1  ;;  %v667_v59 = vmax.f32 %v665_v51, %v666_v55  ;;  %v672_v60 = vrot.slane %v671_v56, 1 }
 0x295   : > { %v674_v57 = vsub.f32 %v603_v26, %v655_v53  ;;  %v661_v58 = vmax.f32 %v659_v50, %v660_v54  ;;  %v676_v63 = vsub.f32 %v644_v31, %v667_v59  ;;  %v673_v0 = vmax.f32 %v671_v56, %v672_v60 }
 0x297   : > { %v678_v61 = vmul.f32 1.442695, %v674_v57  ;;  %v675_v62 = vsub.f32 %v605_v30, %v661_v58  ;;  %v682_v2 = vmul.f32 1.442695, %v676_v63  ;;  %v677_v3 = vsub.f32 %v646_v37, %v673_v0 }
 0x299   : > { %864 = vpow2.f32 %v678_v61  ;;  %v680_v1 = vmul.f32 1.442695, %v675_v62  ;;  %v684_v5 = vmul.f32 1.442695, %v677_v3 }
 0x29b   : > { %866 = vpow2.f32 %v680_v1 }
 0x29c   : > { %868 = vpow2.f32 %v682_v2 }
 0x29d   : > { %870 = vpow2.f32 %v684_v5 }
 0x2a6   : > { %v865_v6 = vpop.eup %864 }
 0x2a7   : > { %v686_v7 = vrot.slane %v865_v6, 4 }
 0x2a8   : > { %v867_v8 = vpop.eup %866 }
 0x2a9   : > { %v869_v9 = vpop.eup %868  ;;  %v687_v10 = vadd.f32 %v865_v6, %v686_v7  ;;  %v692_v11 = vrot.slane %v867_v8, 4 }
 0x2aa   : > { %v871_v12 = vpop.eup %870  ;;  %v698_v4 = vrot.slane %v869_v9, 4 }
 0x2ab   : > { %v688_v13 = vrot.slane %v687_v10, 2  ;;  %v693_v14 = vadd.f32 %v867_v8, %v692_v11  ;;  %v704_v15 = vrot.slane %v871_v12, 4 }
 0x2ac   : > { %v699_v16 = vadd.f32 %v869_v9, %v698_v4 }
 0x2ad   : > { %v689_v17 = vadd.f32 %v688_v13, %v687_v10  ;;  %v694_v18 = vrot.slane %v693_v14, 2  ;;  %v705_v19 = vadd.f32 %v871_v12, %v704_v15 }
 0x2ae   : > { %v700_v20 = vrot.slane %v699_v16, 2 }
 0x2af   : > { %v690_v21 = vrot.slane %v689_v17, 1  ;;  %v695_v22 = vadd.f32 %v694_v18, %v693_v14  ;;  %v706_v23 = vrot.slane %v705_v19, 2 }
 0x2b0   : > { %v701_v24 = vadd.f32 %v700_v20, %v699_v16 }
 0x2b1   : > { %v691_v25 = vadd.f32 %v690_v21, %v689_v17  ;;  %v696_v26 = vrot.slane %v695_v22, 1  ;;  %v707_v27 = vadd.f32 %v706_v23, %v705_v19 }
 0x2b2   : > { %v702_v28 = vrot.slane %v701_v24, 1 }
 0x2b3   : > { %v697_v29 = vadd.f32 %v696_v26, %v695_v22  ;;  %v708_v30 = vrot.slane %v707_v27, 1  ;;  %872 = vrcp.f32 %v691_v25 }
 0x2b4   : > { %v703_v31 = vadd.f32 %v702_v28, %v701_v24 }
 0x2b5   : > { %v709_v32 = vadd.f32 %v708_v30, %v707_v27  ;;  %874 = vrcp.f32 %v697_v29 }
 0x2b6   : > { %876 = vrcp.f32 %v703_v31 }
 0x2b7   : > { %878 = vrcp.f32 %v709_v32 }
 0x2c0   : > { %v873_v33 = vpop.eup %872 }
 0x2c1   : > { %v714_v34 = vmul.f32 %v873_v33, %v865_v6 }
 0x2c2   : > { %v875_v35 = vpop.eup %874 }
 0x2c3   : > { %v877_v36 = vpop.eup %876  ;;  %v715_v37 = vmul.f32 %v875_v35, %v867_v8  ;;  %718 = vst [vmem:[%s272_s23] sm:$0xff] %v714_v34 }
 0x2c4   : > { %v879_v38 = vpop.eup %878  ;;  %v716_v39 = vmul.f32 %v877_v36, %v869_v9 }
 0x2c5   : > { %v717_v40 = vmul.f32 %v879_v38, %v871_v12  ;;  %719 = vst [vmem:[%s272_s23 + $0x8] sm:$0xff] %v715_v37 }
 0x2c6   : > { %720 = vst [vmem:[%s272_s23 + $0x10] sm:$0xff] %v716_v39 }
 0x2c7   : > { %721 = vst [vmem:[%s272_s23 + $0x18] sm:$0xff] %v717_v40 }
 0x2c8   : > { %893 = shalt.err (!%p890_p3)
}
 0x2c9   : > { %s894_s18 = scalar_lea.hbm %s1079_s13, 512  ;;  %s898_s21 = scalar_lea.hbm %s1121_s7, 2048 }
 0x2ca   : > { %p895_p4 = scmp.ne.s32.totalorder %s1079_s13, %s894_s18  ;;  %p899_p9 = scmp.lt.s32.totalorder %s1079_s13, %s1121_s7 }
 0x2cb   : > { %p900_p10 = scmp.lt.s32.totalorder %s898_s21, %s894_s18 }
 0x2cc   : > { %p896_p7 = pnand %p895_p4, %p1024_p5 }
 0x2cd   : > { %p901_p11 = por %p900_p10, %p899_p9 }
 0x2ce   : > { %p897_p8 = pneg %p896_p7 }
 0x2d0   : > { %p902_p12 = pnand %p901_p11, %p897_p8 }
 0x2d2   : > { %905 = shalt.err (!%p902_p12)
}
 0x2d3   : > { %817 = dma.vmem_to_hbm [thread:$0]  (%p1024_p5), %s738_s29, 512, %s1079_s13, %s723_s14  }
 0x2d4 PF: > { %p823_p13 = scmp.ge.s32.totalorder %s940_s27, 2  ;;  %s749_s8 = sand.u32 1, %s928_s24  }
 0x2d5   : > { %s750_s9 = scalar_lea.sflag [#allocation3], %s749_s8 }
 0x2d6   : > { %p820_p0 = pnand %p823_p13, %p1028_p6 }
 0x2d8   : > { %p821_p1 = pneg %p820_p0 }
 0x2da   : > { %923 = dma.done.wait (%p821_p1), %s750_s9, 512  }
 0x2db   : > { %925 = vsyncadd (%p821_p1), %s750_s9, 4294966784  ;;  %p17_p2 = scmp.ge.s32.totalorder %s1011_s30, 6   ;;  %s1124_s24 = smov %s932_s25 }
 0x2dc   : > { %s1125_s25 = smov %s936_s26  ;;  %s1126_s26 = smov %s1022_s10 }
 0x2dd   : > { %s1127_s27 = smov %s1011_s30  ;;  %19 = sbr.rel (!%p17_p2) target bundleno = 3 (0x3), region = 83 }
 0x2e2   :  { %755 = vsyncpa [#allocation3], 1 }
 0x2e3   :  { %757 = vsyncpa [#allocation3 + $0x1], 1 }

</bundles_post_ra>
